<compile_context>
chip_gen: v7x
topology: tpu7x:2x2x1
jax: 0.10.0
libtpu: 0.0.40
codegen_flags: <defaults>
</compile_context>

<pallas_src>
import jax
import jax.numpy as jnp
from jax.experimental import pallas as pl
from jax.experimental.pallas import tpu as pltpu


BN_EPS = 1e-5
HIDDEN = 256
N_CAT = 26
N_CONT = 3
HEAD_PAD = 32          # 26 cat + 3 cont + 3 zero lanes (block last dim == full dim)
SUB = 16               # sublane multiple (safe for bf16 activation blocks)
MAX_TB = 2048          # batch-tile cap; per-block VMEM stays well under limits


def _round_up(x, m):
    return ((x + m - 1) // m) * m


def emotic_kernel(xc_ref, xb_ref, xf_ref, w1c_ref, w1b_ref, w1f_ref,
                  b1_ref, wh_ref, bh_ref, out_ref):
    # fc1 (BatchNorm already folded into the weights/bias), as three K-sliced
    # bf16 MXU dots so the fused input never has to be materialized in HBM.
    h = jnp.dot(xc_ref[...], w1c_ref[...], preferred_element_type=jnp.float32)
    h = h + jnp.dot(xb_ref[...], w1b_ref[...], preferred_element_type=jnp.float32)
    h = h + jnp.dot(xf_ref[...], w1f_ref[...], preferred_element_type=jnp.float32)
    # Bias + ReLU in f32.  Dropout(0.5) in eval mode == identity.
    h = jnp.maximum(h + b1_ref[...], 0.0)
    # Fused cat/cont heads: one bf16 MXU push, one [TB, 32] store.
    out_ref[...] = (jnp.dot(h.astype(wh_ref.dtype), wh_ref[...],
                            preferred_element_type=jnp.float32) + bh_ref[...])


def emotic_forward(x_context, x_body, x_face, params):
    """Folds BN into fc1, fuses the heads, and calls the Pallas kernel."""
    nc = params["num_context_features"]
    nb = params["num_body_features"]
    nf = params["num_face_features"]
    fused = nc + nb + nf

    # torch .view(-1, F) equivalents; keep the three streams separate
    # (no HBM concat) and cast to bf16 for the MXU.
    xc = x_context.reshape(-1, nc).astype(jnp.bfloat16)
    xb = x_body.reshape(-1, nb).astype(jnp.bfloat16)
    xf = x_face.reshape(-1, nf).astype(jnp.bfloat16)
    B = xc.shape[0]

    # Fold BatchNorm (eval mode) into fc1 weight/bias (trace-time constant math).
    scale = params["bn_gamma"] * jax.lax.rsqrt(params["bn_var"] + BN_EPS)   # [256]
    w1 = params["w1"].T * scale[None, :]                   # [fused, 256] f32
    b1 = ((params["b1"] - params["bn_mean"]) * scale
          + params["bn_beta"]).reshape(1, HIDDEN)          # [1, 256] f32
    w1c = w1[:nc].astype(jnp.bfloat16)                     # [nc, 256]
    w1b = w1[nc:nc + nb].astype(jnp.bfloat16)              # [nb, 256]
    w1f = w1[nc + nb:].astype(jnp.bfloat16)                # [nf, 256]

    # Fuse the two heads into one lane-padded [256, 32] weight / [1, 32] bias.
    wh = jnp.concatenate(
        [params["w_cat"].T, params["w_cont"].T,
         jnp.zeros((HIDDEN, HEAD_PAD - N_CAT - N_CONT), jnp.float32)],
        axis=1).astype(jnp.bfloat16)
    bh = jnp.concatenate(
        [params["b_cat"], params["b_cont"],
         jnp.zeros((HEAD_PAD - N_CAT - N_CONT,), jnp.float32)]).reshape(1, HEAD_PAD)

    # Batch tiling: big tiles to amortize the ~0.35 us per-step overhead, and
    # >=2 grid steps when the batch allows so both v7x TensorCores engage.
    B_pad = _round_up(B, SUB)
    if B_pad <= 2 * SUB:
        TB = B_pad                                    # too small to split
    elif B_pad <= 2 * MAX_TB:
        TB = _round_up(pl.cdiv(B_pad, 2), SUB)        # exactly two tiles
        B_pad = 2 * TB
    else:
        TB = MAX_TB
        B_pad = _round_up(B_pad, TB)

    if B_pad != B:
        pad = B_pad - B
        xc = jnp.pad(xc, ((0, pad), (0, 0)))
        xb = jnp.pad(xb, ((0, pad), (0, 0)))
        xf = jnp.pad(xf, ((0, pad), (0, 0)))

    grid = (B_pad // TB,)

    cost = pl.CostEstimate(
        flops=2 * B_pad * (fused * HIDDEN + HIDDEN * HEAD_PAD),
        transcendentals=0,
        bytes_accessed=(2 * B_pad * fused                          # bf16 activations
                        + 2 * (fused * HIDDEN + HIDDEN * HEAD_PAD)  # bf16 weights
                        + 4 * (HIDDEN + HEAD_PAD)                   # f32 biases
                        + 4 * B_pad * HEAD_PAD),                    # f32 output
    )

    out_pad = pl.pallas_call(
        emotic_kernel,
        out_shape=jax.ShapeDtypeStruct((B_pad, HEAD_PAD), jnp.float32),
        grid_spec=pltpu.PrefetchScalarGridSpec(
            num_scalar_prefetch=0,
            grid=grid,
            in_specs=[
                pl.BlockSpec((TB, nc), lambda i: (i, 0)),           # context acts
                pl.BlockSpec((TB, nb), lambda i: (i, 0)),           # body acts
                pl.BlockSpec((TB, nf), lambda i: (i, 0)),           # face acts
                pl.BlockSpec((nc, HIDDEN), lambda i: (0, 0)),       # W1' ctx (resident)
                pl.BlockSpec((nb, HIDDEN), lambda i: (0, 0)),       # W1' body
                pl.BlockSpec((nf, HIDDEN), lambda i: (0, 0)),       # W1' face
                pl.BlockSpec((1, HIDDEN), lambda i: (0, 0)),        # b1'
                pl.BlockSpec((HIDDEN, HEAD_PAD), lambda i: (0, 0)), # fused head W
                pl.BlockSpec((1, HEAD_PAD), lambda i: (0, 0)),      # fused head b
            ],
            out_specs=pl.BlockSpec((TB, HEAD_PAD), lambda i: (i, 0)),
        ),
        compiler_params=pltpu.CompilerParams(
            dimension_semantics=("parallel",)),
        cost_estimate=cost,
    )(xc, xb, xf, w1c, w1b, w1f, b1, wh, bh)

    cat_out = out_pad[:B, :N_CAT]
    cont_out = out_pad[:B, N_CAT:N_CAT + N_CONT]
    return cat_out, cont_out


def init_params(key, num_context_features, num_body_features, num_face_features):
    """Deterministic synthetic parameters matching the module's shapes."""
    fused = num_context_features + num_body_features + num_face_features
    keys = jax.random.split(key, 8)
    scale1 = 1.0 / jnp.sqrt(fused)
    scale2 = 1.0 / jnp.sqrt(256.0)
    return {
        "num_context_features": num_context_features,
        "num_body_features": num_body_features,
        "num_face_features": num_face_features,
        "w1": jax.random.uniform(keys[0], (256, fused), jnp.float32, -scale1, scale1),
        "b1": jax.random.uniform(keys[1], (256,), jnp.float32, -scale1, scale1),
        "bn_gamma": jnp.ones((256,), jnp.float32),
        "bn_beta": jnp.zeros((256,), jnp.float32),
        "bn_mean": 0.05 * jax.random.normal(keys[2], (256,), jnp.float32),
        "bn_var": jnp.abs(jax.random.normal(keys[3], (256,), jnp.float32)) + 0.5,
        "w_cat": jax.random.uniform(keys[4], (26, 256), jnp.float32, -scale2, scale2),
        "b_cat": jax.random.uniform(keys[5], (26,), jnp.float32, -scale2, scale2),
        "w_cont": jax.random.uniform(keys[6], (3, 256), jnp.float32, -scale2, scale2),
        "b_cont": jax.random.uniform(keys[7], (3,), jnp.float32, -scale2, scale2),
    }


def reference_forward(x_context, x_body, x_face, params):
    """Pure-JAX f32 reference mirroring the PyTorch forward (eval mode)."""
    nc, nb, nf = (params["num_context_features"],
                  params["num_body_features"],
                  params["num_face_features"])
    fuse = jnp.concatenate(
        [x_context.reshape(-1, nc), x_body.reshape(-1, nb), x_face.reshape(-1, nf)],
        axis=1)
    h = fuse @ params["w1"].T + params["b1"]
    h = ((h - params["bn_mean"]) / jnp.sqrt(params["bn_var"] + BN_EPS)
         * params["bn_gamma"] + params["bn_beta"])
    h = jnp.maximum(h, 0.0)
    cat_out = h @ params["w_cat"].T + params["b_cat"]
    cont_out = h @ params["w_cont"].T + params["b_cont"]
    return cat_out, cont_out


if __name__ == "__main__":
    num_context_features = 32
    num_body_features = 16
    num_face_features = 16
    batch = 8

    key = jax.random.PRNGKey(0)
    kp, kc, kb, kf = jax.random.split(key, 4)
    params = init_params(kp, num_context_features, num_body_features,
                         num_face_features)

    # Feature extractors in the real pipeline emit flattened features;
    # the module's .view(-1, F) also accepts trailing singleton dims.
    x_context = jax.random.normal(kc, (batch, num_context_features, 1, 1), jnp.float32)
    x_body = jax.random.normal(kb, (batch, num_body_features, 1, 1), jnp.float32)
    x_face = jax.random.normal(kf, (batch, num_face_features), jnp.float32)

    cat_out, cont_out = emotic_forward(x_context, x_body, x_face, params)
    jax.block_until_ready((cat_out, cont_out))

    ref_cat, ref_cont = reference_forward(x_context, x_body, x_face, params)
    assert cat_out.shape == (batch, 26) and cont_out.shape == (batch, 3)
    # bf16 MXU inputs with f32 accumulation: ~2^-8 relative error vs f32 reference.
    assert jnp.allclose(cat_out, ref_cat, atol=3e-2, rtol=3e-2)
    assert jnp.allclose(cont_out, ref_cont, atol=3e-2, rtol=3e-2)

    print("KERNEL_OK")
</pallas_src>

<mosaic_0001>
module attributes {stable_mosaic.version = 11 : i64} {
  func.func @emotic_kernel(%arg0: i32, %arg1: memref<16x32xbf16, #tpu.memory_space<vmem>>, %arg2: memref<16x16xbf16, #tpu.memory_space<vmem>>, %arg3: memref<16x16xbf16, #tpu.memory_space<vmem>>, %arg4: memref<32x256xbf16, #tpu.memory_space<vmem>>, %arg5: memref<16x256xbf16, #tpu.memory_space<vmem>>, %arg6: memref<16x256xbf16, #tpu.memory_space<vmem>>, %arg7: memref<1x256xf32, #tpu.memory_space<vmem>>, %arg8: memref<256x32xbf16, #tpu.memory_space<vmem>>, %arg9: memref<1x32xf32, #tpu.memory_space<vmem>>, %arg10: memref<16x32xf32, #tpu.memory_space<vmem>>) attributes {dimension_semantics = [#tpu.dimension_semantics<parallel>], iteration_bounds = array<i64: 1>, scalar_prefetch = 0 : i64, scratch_operands = 0 : i64, tpu.core_type = #tpu.core_type<tc>, window_params = [{transform_indices = @transform_0, window_bounds = array<i64: 16, 32>}, {transform_indices = @transform_1, window_bounds = array<i64: 16, 16>}, {transform_indices = @transform_2, window_bounds = array<i64: 16, 16>}, {pipeline_mode = #tpu.pipeline_mode<synchronous>, transform_indices = @transform_3, window_bounds = array<i64: 32, 256>}, {pipeline_mode = #tpu.pipeline_mode<synchronous>, transform_indices = @transform_4, window_bounds = array<i64: 16, 256>}, {pipeline_mode = #tpu.pipeline_mode<synchronous>, transform_indices = @transform_5, window_bounds = array<i64: 16, 256>}, {pipeline_mode = #tpu.pipeline_mode<synchronous>, transform_indices = @transform_6, window_bounds = array<i64: 1, 256>}, {pipeline_mode = #tpu.pipeline_mode<synchronous>, transform_indices = @transform_7, window_bounds = array<i64: 256, 32>}, {pipeline_mode = #tpu.pipeline_mode<synchronous>, transform_indices = @transform_8, window_bounds = array<i64: 1, 32>}, {transform_indices = @transform_9, window_bounds = array<i64: 16, 32>}]} {
    %c0 = arith.constant 0 : index
    %c0_0 = arith.constant 0 : index
    %0 = vector.load %arg1[%c0, %c0_0] : memref<16x32xbf16, #tpu.memory_space<vmem>>, vector<16x32xbf16>
    %c0_1 = arith.constant 0 : index
    %c0_2 = arith.constant 0 : index
    %1 = vector.load %arg4[%c0_1, %c0_2] : memref<32x256xbf16, #tpu.memory_space<vmem>>, vector<32x256xbf16>
    %cst = arith.constant dense<0.000000e+00> : vector<16x256xf32>
    %2 = tpu.matmul %0, %1, %cst {dimension_numbers = #tpu.dot_dimension_numbers<[1], [0], [0], [1], [0, 0, 1, 1], [], []>} : vector<16x32xbf16>, vector<32x256xbf16>, vector<16x256xf32> -> vector<16x256xf32>
    %c0_3 = arith.constant 0 : index
    %c0_4 = arith.constant 0 : index
    %3 = vector.load %arg2[%c0_3, %c0_4] : memref<16x16xbf16, #tpu.memory_space<vmem>>, vector<16x16xbf16>
    %c0_5 = arith.constant 0 : index
    %c0_6 = arith.constant 0 : index
    %4 = vector.load %arg5[%c0_5, %c0_6] : memref<16x256xbf16, #tpu.memory_space<vmem>>, vector<16x256xbf16>
    %cst_7 = arith.constant dense<0.000000e+00> : vector<16x256xf32>
    %5 = tpu.matmul %3, %4, %cst_7 {dimension_numbers = #tpu.dot_dimension_numbers<[1], [0], [0], [1], [0, 0, 1, 1], [], []>} : vector<16x16xbf16>, vector<16x256xbf16>, vector<16x256xf32> -> vector<16x256xf32>
    %6 = arith.addf %2, %5 : vector<16x256xf32>
    %c0_8 = arith.constant 0 : index
    %c0_9 = arith.constant 0 : index
    %7 = vector.load %arg3[%c0_8, %c0_9] : memref<16x16xbf16, #tpu.memory_space<vmem>>, vector<16x16xbf16>
    %c0_10 = arith.constant 0 : index
    %c0_11 = arith.constant 0 : index
    %8 = vector.load %arg6[%c0_10, %c0_11] : memref<16x256xbf16, #tpu.memory_space<vmem>>, vector<16x256xbf16>
    %cst_12 = arith.constant dense<0.000000e+00> : vector<16x256xf32>
    %9 = tpu.matmul %7, %8, %cst_12 {dimension_numbers = #tpu.dot_dimension_numbers<[1], [0], [0], [1], [0, 0, 1, 1], [], []>} : vector<16x16xbf16>, vector<16x256xbf16>, vector<16x256xf32> -> vector<16x256xf32>
    %10 = arith.addf %6, %9 : vector<16x256xf32>
    %c0_13 = arith.constant 0 : index
    %c0_14 = arith.constant 0 : index
    %11 = vector.load %arg7[%c0_13, %c0_14] : memref<1x256xf32, #tpu.memory_space<vmem>>, vector<1x256xf32>
    %12 = vector.broadcast %11 : vector<1x256xf32> to vector<16x256xf32>
    %13 = arith.addf %10, %12 : vector<16x256xf32>
    %cst_15 = arith.constant 0.000000e+00 : f32
    %14 = vector.broadcast %cst_15 : f32 to vector<16x256xf32>
    %15 = arith.maximumf %13, %14 : vector<16x256xf32>
    %16 = arith.truncf %15 : vector<16x256xf32> to vector<16x256xbf16>
    %c0_16 = arith.constant 0 : index
    %c0_17 = arith.constant 0 : index
    %17 = vector.load %arg8[%c0_16, %c0_17] : memref<256x32xbf16, #tpu.memory_space<vmem>>, vector<256x32xbf16>
    %cst_18 = arith.constant dense<0.000000e+00> : vector<16x32xf32>
    %18 = tpu.matmul %16, %17, %cst_18 {dimension_numbers = #tpu.dot_dimension_numbers<[1], [0], [0], [1], [0, 0, 1, 1], [], []>} : vector<16x256xbf16>, vector<256x32xbf16>, vector<16x32xf32> -> vector<16x32xf32>
    %c0_19 = arith.constant 0 : index
    %c0_20 = arith.constant 0 : index
    %19 = vector.load %arg9[%c0_19, %c0_20] : memref<1x32xf32, #tpu.memory_space<vmem>>, vector<1x32xf32>
    %20 = vector.broadcast %19 : vector<1x32xf32> to vector<16x32xf32>
    %21 = arith.addf %18, %20 : vector<16x32xf32>
    %c0_21 = arith.constant 0 : index
    %c0_22 = arith.constant 0 : index
    %22 = vector.load %arg10[%c0_21, %c0_22] : memref<16x32xf32, #tpu.memory_space<vmem>>, vector<16x32xf32>
    tpu.vector_store %arg10[%c0_21, %c0_22], %21 {strides = array<i32>} : memref<16x32xf32, #tpu.memory_space<vmem>>, vector<16x32xf32>,
    return
  }
  func.func @transform_0(%arg0: i32) -> (i32, i32) {
    %c0_i32 = arith.constant 0 : i32
    %c0_i32_0 = arith.constant 0 : i32
    return %arg0, %c0_i32 : i32, i32
  }
  func.func @transform_1(%arg0: i32) -> (i32, i32) {
    %c0_i32 = arith.constant 0 : i32
    %c0_i32_0 = arith.constant 0 : i32
    return %arg0, %c0_i32 : i32, i32
  }
  func.func @transform_2(%arg0: i32) -> (i32, i32) {
    %c0_i32 = arith.constant 0 : i32
    %c0_i32_0 = arith.constant 0 : i32
    return %arg0, %c0_i32 : i32, i32
  }
  func.func @transform_3(%arg0: i32) -> (i32, i32) {
    %c0_i32 = arith.constant 0 : i32
    %c0_i32_0 = arith.constant 0 : i32
    %c0_i32_1 = arith.constant 0 : i32
    return %c0_i32, %c0_i32_0 : i32, i32
  }
  func.func @transform_4(%arg0: i32) -> (i32, i32) {
    %c0_i32 = arith.constant 0 : i32
    %c0_i32_0 = arith.constant 0 : i32
    %c0_i32_1 = arith.constant 0 : i32
    return %c0_i32, %c0_i32_0 : i32, i32
  }
  func.func @transform_5(%arg0: i32) -> (i32, i32) {
    %c0_i32 = arith.constant 0 : i32
    %c0_i32_0 = arith.constant 0 : i32
    %c0_i32_1 = arith.constant 0 : i32
    return %c0_i32, %c0_i32_0 : i32, i32
  }
  func.func @transform_6(%arg0: i32) -> (i32, i32) {
    %c0_i32 = arith.constant 0 : i32
    %c0_i32_0 = arith.constant 0 : i32
    %c0_i32_1 = arith.constant 0 : i32
    return %c0_i32, %c0_i32_0 : i32, i32
  }
  func.func @transform_7(%arg0: i32) -> (i32, i32) {
    %c0_i32 = arith.constant 0 : i32
    %c0_i32_0 = arith.constant 0 : i32
    %c0_i32_1 = arith.constant 0 : i32
    return %c0_i32, %c0_i32_0 : i32, i32
  }
  func.func @transform_8(%arg0: i32) -> (i32, i32) {
    %c0_i32 = arith.constant 0 : i32
    %c0_i32_0 = arith.constant 0 : i32
    %c0_i32_1 = arith.constant 0 : i32
    return %c0_i32, %c0_i32_0 : i32, i32
  }
  func.func @transform_9(%arg0: i32) -> (i32, i32) {
    %c0_i32 = arith.constant 0 : i32
    %c0_i32_0 = arith.constant 0 : i32
    return %arg0, %c0_i32 : i32, i32
  }
}

</mosaic_0001>

<bundles_post_ra>
// kernel: tpu_custom_call.1
= control target key start
LH: loop header
LB: loop body
LE: loop exit
PB: predicated region body
PF: predicated region fallthrough
CT: control target
= control target key end

     0   :  { %v583_v2 = vmov 0   ;;  %vm59_vm0 = vcmask 130048   ;;  %vm131_vm1 = vcmask 261120   ;;  %s741_s0 = inlined_call_operand.vmem [shape: bf16[16,32], index: 0, kind: input, shape index: {}]   ;;  %s742_s1 = inlined_call_operand.vmem [shape: bf16[16,16], index: 1, kind: input, shape index: {}]   ;;  %s743_s2 = inlined_call_operand.vmem [shape: bf16[16,16], index: 2, kind: input, shape index: {}]   ;;  %s744_s3 = inlined_call_operand.vmem [shape: bf16[32,256], index: 3, kind: input, shape index: {}]   ;;  %s745_s4 = inlined_call_operand.vmem [shape: bf16[16,256], index: 4, kind: input, shape index: {}]   ;;  %s746_s5 = inlined_call_operand.vmem [shape: bf16[16,256], index: 5, kind: input, shape index: {}]   ;;  %s747_s6 = inlined_call_operand.vmem [shape: f32[1,256], index: 6, kind: input, shape index: {}]   ;;  %s748_s7 = inlined_call_operand.vmem [shape: bf16[256,32], index: 7, kind: input, shape index: {}]   ;;  %s749_s8 = inlined_call_operand.vmem [shape: f32[1,32], index: 8, kind: input, shape index: {}]   ;;  %s750_s9 = inlined_call_operand.hbm [shape: f32[16,32], index: 9, kind: output, shape index: {}]  }
   0x1   :  { %v528_v0 = vld [vmem:[%s745_s4 + $0x4] ss:$8 sps:$4 sm:$0xff]   ;;  %v530_v1 = vld [vmem:[%s745_s4] ss:$8 sps:$4 sm:$0xff]   ;;  %95 = vmatprep.mubr.bf16.mxu0 %v583_v2  ;;  %v537_v6 = vld [vmem:[%s744_s3 + $0x14] ss:$8 sps:$4 sm:$0xff]  }
   0x2   :  { %63 = vmatprep.subr.bf16.mxu0 %v528_v0  ;;  %v531_v3 = vld [vmem:[%s742_s1] sm:$0xff]   ;;  %v535_v7 = vld [vmem:[%s744_s3 + $0x10] ss:$8 sps:$4 sm:$0xff]   ;;  %v545_v11 = vld [vmem:[%s748_s7 + $0x48] sm:$0xff]  }
   0x3   :  { %64 = vmatpush1.bf16.msra.mxu0 %v530_v1  ;;  %v532_v4 = vld [vmem:[%s744_s3] ss:$8 sps:$4 sm:$0xff]   ;;  %v534_v5 = vld [vmem:[%s744_s3 + $0x4] ss:$8 sps:$4 sm:$0xff]   ;;  %v547_v13 = vld [vmem:[%s748_s7 + $0x50] sm:$0xff]  }
   0x4   :  { %135 = vmatprep.subr.bf16.mxu0 %v534_v5  ;;  %v541_v8 = vld [vmem:[%s746_s5 + $0x4] ss:$8 sps:$4 sm:$0xff]   ;;  %v539_v15 = vld [vmem:[%s746_s5] ss:$8 sps:$4 sm:$0xff]   ;;  %v548_v16 = vld [vmem:[%s748_s7 + $0x10] sm:$0xff]  }
   0x5   :  { %v543_v9 = vld [vmem:[%s748_s7 + $0x40] sm:$0xff]   ;;  %v546_v12 = vld [vmem:[%s748_s7 + $0x8] sm:$0xff]   ;;  %v549_v17 = vld [vmem:[%s748_s7 + $0x58] sm:$0xff]  }
   0x6   :  { %466 = vmatmul.mubr.msk.bf16.vlgmr.msra.gmra.mrb[0].mxu0 %vm59_vm0, %v531_v3  ;;  %v544_v10 = vld [vmem:[%s748_s7] sm:$0xff]   ;;  %494 = vmatprep.subr.bf16.mxu1 %v543_v9  ;;  %v550_v18 = vld [vmem:[%s748_s7 + $0x18] sm:$0xff]  }
   0x7   :  { %136 = vmatpush1.bf16.msra.mxu0 %v532_v4  ;;  %167 = vmatprep.mubr.bf16.mxu0 %v583_v2  ;;  %v538_v14 = vld [vmem:[%s741_s0] sm:$0xff]  }
   0x8   :  { %137 = vmatprep.subr.bf16.mxu0 %v537_v6  ;;  %495 = vmatpush3.bf16.msra.mxu1 %v544_v10  ;;  %v551_v19 = vld [vmem:[%s748_s7 + $0x60] sm:$0xff]  }
   0x9   :  { %496 = vmatprep.subr.bf16.mxu1 %v545_v11 }
   0xb   :  { %138 = vmatpush1.bf16.msra.mxu0 %v535_v7 }
   0xc   :  { %200 = vmatprep.subr.bf16.mxu0 %v541_v8  ;;  %497 = vmatpush3.bf16.msra.mxu1 %v546_v12 }
   0xd   :  { %498 = vmatprep.subr.bf16.mxu1 %v547_v13 }
  0x10   :  { %499 = vmatpush3.bf16.msra.mxu1 %v548_v16 }
  0x11   :  { %500 = vmatprep.subr.bf16.mxu1 %v549_v17 }
  0x12   :  { %472 = vmatmul.mubr.msk.bf16.vlgmr.msra.gmra.mrb[0].mxu0 %vm131_vm1, %v538_v14 }
  0x13   :  { %201 = vmatpush1.bf16.msra.mxu0 %v539_v15  ;;  %232 = vmatprep.mubr.bf16.mxu0 %v583_v2 }
  0x14   :  { %14 = vsyncpa [#allocation3], 0  ;;  %501 = vmatpush3.bf16.msra.mxu1 %v550_v18  ;;  %v552_v20 = vld [vmem:[%s748_s7 + $0x20] sm:$0xff]   ;;  %v553_v21 = vld [vmem:[%s748_s7 + $0x68] sm:$0xff]   ;;  %v249_v28 = vlaneseq  ;;  %s584_s14 = smov [#allocation2]  }
  0x15   :  { %502 = vmatprep.subr.bf16.mxu1 %v551_v19  ;;  %v542_v22 = vld [vmem:[%s743_s2] sm:$0xff]   ;;  %v554_v23 = vld [vmem:[%s748_s7 + $0x28] sm:$0xff]   ;;  %v555_v24 = vld [vmem:[%s748_s7 + $0x70] sm:$0xff]   ;;  %s452_s15 = sshll.u32 %s584_s14, 4  ;;  %s453_s15 = int_to_ptr.vmem [resolvable:$true] %s452_s15 }
  0x16   :  { %v556_v25 = vld [vmem:[%s748_s7 + $0x30] sm:$0xff]   ;;  %v557_v26 = vld [vmem:[%s748_s7 + $0x78] sm:$0xff]   ;;  %v250_v29 = vshrl.u32 %v249_v28, 7  ;;  %v247_v31 = vld [vmem:[%s747_s6] sm:$0x3]  ;;  %s559_s16 = scalar_lea.vmem %s453_s15, 256  ;;  %p564_p1 = scmp.lt.s32.totalorder %s453_s15, %s453_s15 }
  0x17   :  { %v558_v27 = vld [vmem:[%s748_s7 + $0x38] sm:$0xff]   ;;  %v477_v50 = vld [vmem:[%s749_s8] ss:$0 sm:$0xff]  ;;  %p560_p0 = scmp.ne.s32.totalorder %s453_s15, %s559_s16  ;;  %p565_p2 = scmp.lt.s32.totalorder %s559_s16, %s559_s16 }
  0x18   :  { %503 = vmatpush3.bf16.msra.mxu1 %v552_v20  ;;  %v251_v30 = vsub.s32 0, %v250_v29  ;;  %v255_v32 = vsub.s32 1, %v250_v29 }
  0x19   :  { %504 = vmatprep.subr.bf16.mxu1 %v553_v21  ;;  %p566_p3 = por %p565_p2, %p564_p1 }
  0x1a   :  { %v252_v33 = vrot.slane %v247_v31, %v251_v30  ;;  %v256_v34 = vrot.slane %v247_v31, %v255_v32 }
  0x1b   :  { %p567_p4 = pnand %p566_p3, %p560_p0 }
  0x1c   :  { %505 = vmatpush3.bf16.msra.mxu1 %v554_v23 }
  0x1d   :  { %506 = vmatprep.subr.bf16.mxu1 %v555_v24 }
  0x1e   :  { %476 = vmatmul.mubr.msk.bf16.vlgmr.msra.gmra.mrb[0].mxu0 %vm59_vm0, %v542_v22 }
  0x20   :  { %507 = vmatpush3.bf16.msra.mxu1 %v556_v25 }
  0x21   :  { %508 = vmatprep.subr.bf16.mxu1 %v557_v26 }
  0x24   :  { %509 = vmatpush3.bf16.msra.mxu1 %v558_v27 }
  0xf1   :  { %v234_v35 = vpop.f32.mrb[0].mxu0 }
  0xf2   :  { %v259_v36 = vadd.f32 %v252_v33, %v234_v35  ;;  %v236_v37 = vpop.f32.mrb[1].mxu0 }
  0xf3   :  { %v260_v38 = vadd.f32 %v256_v34, %v236_v37  ;;  %v238_v39 = vpop.f32.mrb[2].mxu0 }
  0xf4   :  { %v261_v40 = vadd.f32 %v252_v33, %v238_v39  ;;  %v240_v41 = vpop.f32.mrb[3].mxu0  ;;  %v263_v43 = vmax.f32 %v259_v36, 0.0 }
  0xf5   :  { %v262_v42 = vadd.f32 %v256_v34, %v240_v41  ;;  %v264_v45 = vmax.f32 %v260_v38, 0.0 }
  0xf6   :  { %v265_v44 = vmax.f32 %v261_v40, 0.0 }
  0xf7   :  { %v266_v46 = vmax.f32 %v262_v42, 0.0 }
  0xf8   :  { %v267_v47 = vpack.c.bf16 %v265_v44, %v263_v43 }
  0xf9   :  { %v268_v48 = vpack.c.bf16 %v266_v46, %v264_v45 }
  0xfb   :  { %436 = vmatprep.mubr.bf16.mxu1 %v268_v48 }
  0xfc   :  { %437 = vmatmul.mubr.bf16.vlgmr.msra.gmra.mrb[0].mxu1 %v267_v47 }
 0x1cf   :  { %v510_v49 = vpop.f32.mrb[0].mxu1 }
 0x1d0   :  { %v511_v51 = vpop.f32.mrb[1].mxu1 }
 0x1d1   :  { %v512_v52 = vadd.f32 %v511_v51, %v510_v49  ;;  %v513_v53 = vpop.f32.mrb[2].mxu1 }
 0x1d2   :  { %v514_v54 = vpop.f32.mrb[3].mxu1 }
 0x1d3   :  { %v439_v55 = vadd.f32 %v512_v52, %v477_v50  ;;  %v515_v56 = vadd.f32 %v514_v54, %v513_v53 }
 0x1d5   :  { %445 = vst.msk [vmem:[#allocation2] sm:$0xff] %vm131_vm1, %v439_v55  ;;  %v442_v57 = vadd.f32 %v515_v56, %v477_v50 }
 0x1d7   :  { %446 = vst.msk [vmem:[#allocation2 + $0x8] sm:$0xff] %vm131_vm1, %v442_v57 }
 0x1d8   :  { %570 = shalt.err (!%p567_p4)
}
 0x1d9   :  { %s571_s18 = scalar_lea.hbm %s750_s9, 256 }
 0x1da   :  { %p572_p5 = scmp.ne.s32.totalorder %s750_s9, %s571_s18  ;;  %p575_p6 = scmp.lt.u32.totalorder %s571_s18, %s750_s9 }
 0x1dc   :  { %p577_p7 = pnand %p575_p6, %p572_p5 }
 0x1de   :  { %580 = shalt.err (!%p577_p7)
}
 0x1df   :  { %s585_s4 = smov 128   ;;  %s586_s1 = smov 8  }
 0x1e0   :  { %458 = dma.vmem_to_hbm [thread:$0]  %s453_s15, 256, %s750_s9, [#allocation3], %s585_s4, %s585_s4, %s586_s1  }
 0x1e1   :  { %581 = dma.done.wait [#allocation3], 256  }
 0x1e2   :  { %582 = vsyncadd [#allocation3], 4294967040 }
 0x1e3   :  { %462 = vsyncpa [#allocation3], 1 }

</bundles_post_ra>
